<compile_context>
chip_gen: v6e
topology: v6e:2x2x1
jax: 0.10.0
libtpu: 0.0.40
codegen_flags: <defaults>
</compile_context>

<pallas_src>
import jax
import jax.numpy as jnp
from jax.experimental import pallas as pl
from jax.experimental.pallas import tpu as pltpu


STATE_DIM = 2
ACT_DIM = 2
H_DIM = 8
CONTEXT_LEN = 5

IN_DIM = CONTEXT_LEN * STATE_DIM + ACT_DIM   # 12
OUT_DIM = 1


def _round_up(x, m):
    return ((x + m - 1) // m) * m


def _swish(z):
    # z * sigmoid(z) with the divide on the (nearly free) EUP reciprocal slot.
    return z * pl.reciprocal(1.0 + jnp.exp(-z), approx=True)


def energy_kernel(x_ref,
                  w1_ref, b1_ref,
                  w2_ref, b2_ref,
                  w3_ref, b3_ref,
                  w4_ref, b4_ref,
                  w5_ref, b5_ref,
                  o_ref):
    """One batch tile: activations are (features, TB), weights are (out, in)."""
    h = x_ref[...]                                                     # (12, TB)
    h = _swish(jnp.dot(w1_ref[...], h,
                       preferred_element_type=jnp.float32) + b1_ref[...])  # (8, TB)
    h = _swish(jnp.dot(w2_ref[...], h,
                       preferred_element_type=jnp.float32) + b2_ref[...])  # (8, TB)
    h = _swish(jnp.dot(w3_ref[...], h,
                       preferred_element_type=jnp.float32) + b3_ref[...])  # (8, TB)
    h = _swish(jnp.dot(w4_ref[...], h,
                       preferred_element_type=jnp.float32) + b4_ref[...])  # (8, TB)
    o_ref[...] = (jnp.dot(w5_ref[...], h,
                          preferred_element_type=jnp.float32) + b5_ref[...]
                  ).astype(o_ref.dtype)                                    # (1, TB)


def init_params(key, scale=0.01):
    """Mirror the PyTorch init: weight ~ N(0, scale) in torch (out, in) layout,
    bias = 0 stored as (out, 1) for lane-broadcast adds."""
    layer_dims = [(IN_DIM, H_DIM), (H_DIM, H_DIM), (H_DIM, H_DIM),
                  (H_DIM, H_DIM), (H_DIM, OUT_DIM)]
    keys = jax.random.split(key, len(layer_dims))
    params = []
    for k, (d_in, d_out) in zip(keys, layer_dims):
        w = scale * jax.random.normal(k, (d_out, d_in), dtype=jnp.float32)
        b = jnp.zeros((d_out, 1), dtype=jnp.float32)
        params.append((w, b))
    return params


def energy_func(states, actions, params, tb=1024):
    """states: (B, context_len, state_dim); actions: (B, act_dim) -> (B, 1)."""
    B = states.shape[0]
    x = jnp.concatenate(
        [states.reshape(B, -1), actions.reshape(B, -1)], axis=-1
    ).astype(jnp.float32)                         # (B, 12)
    xt = x.T                                      # (12, B)  batch on lanes

    # Batch tile: multiple of 128, no larger than needed, capped for v7x VMEM.
    tb = _round_up(min(tb, _round_up(B, 128)), 128)
    b_pad = _round_up(B, tb)
    if b_pad != B:
        xt = jnp.pad(xt, ((0, 0), (0, b_pad - B)))
    n_tiles = b_pad // tb

    flat_params = []
    param_specs = []
    for w, b in params:
        flat_params.extend([w, b])
        # Constant index maps -> parameters are DMA'd once, stay VMEM-resident.
        param_specs.append(pl.BlockSpec(w.shape, lambda i: (0, 0)))
        param_specs.append(pl.BlockSpec(b.shape, lambda i: (0, 0)))

    flops = 2 * b_pad * (IN_DIM * H_DIM + 3 * H_DIM * H_DIM + H_DIM * OUT_DIM)
    transcendentals = 8 * b_pad * H_DIM           # 4 layers x (exp + rcp)
    param_bytes = 4 * sum(int(w.size) + int(b.size) for w, b in params)
    bytes_accessed = 4 * b_pad * (IN_DIM + OUT_DIM) + param_bytes

    out = pl.pallas_call(
        energy_kernel,
        out_shape=jax.ShapeDtypeStruct((OUT_DIM, b_pad), jnp.float32),
        grid=(n_tiles,),
        in_specs=[pl.BlockSpec((IN_DIM, tb), lambda i: (0, i))] + param_specs,
        out_specs=pl.BlockSpec((OUT_DIM, tb), lambda i: (0, i)),
        compiler_params=pltpu.CompilerParams(
            dimension_semantics=("parallel",),
            vmem_limit_bytes=32 * 1024 * 1024),
        cost_estimate=pl.CostEstimate(
            flops=flops,
            transcendentals=transcendentals,
            bytes_accessed=bytes_accessed),
    )(xt, *flat_params)

    return out[:, :B].T                           # (B, 1)


def _reference(states, actions, params):
    """Pure-JAX reference matching the PyTorch forward."""
    B = states.shape[0]
    x = jnp.concatenate(
        [states.reshape(B, -1), actions.reshape(B, -1)], axis=-1
    ).astype(jnp.float32)
    h = x
    for i, (w, b) in enumerate(params):
        h = h @ w.T + b.T
        if i < len(params) - 1:
            h = h * jax.nn.sigmoid(h)
    return h


if __name__ == "__main__":
    key = jax.random.PRNGKey(0)
    pkey, skey, akey, p2key = jax.random.split(key, 4)

    B = 4
    states = jax.random.normal(skey, (B, CONTEXT_LEN, STATE_DIM), dtype=jnp.float32)
    actions = jax.random.normal(akey, (B, ACT_DIM), dtype=jnp.float32)

    # Module-faithful parameters (weights ~ N(0, 0.01), biases = 0).
    params = init_params(pkey, scale=0.01)
    out = jax.block_until_ready(energy_func(states, actions, params))
    assert out.shape == (B, OUT_DIM), out.shape
    ref = _reference(states, actions, params)
    assert jnp.allclose(out, ref, atol=1e-5, rtol=1e-2), (out, ref)

    # Larger-scale params to meaningfully exercise the approx-sigmoid numerics.
    params2 = init_params(p2key, scale=0.5)
    out2 = jax.block_until_ready(energy_func(states, actions, params2))
    ref2 = _reference(states, actions, params2)
    assert jnp.allclose(out2, ref2, atol=1e-3, rtol=1e-2), (out2, ref2)

    print("KERNEL_OK")
</pallas_src>

<mosaic_0001>
module attributes {stable_mosaic.version = 11 : i64} {
  func.func @energy_kernel(%arg0: i32, %arg1: memref<12x128xf32, #tpu.memory_space<vmem>>, %arg2: memref<8x12xf32, #tpu.memory_space<vmem>>, %arg3: memref<8x1xf32, #tpu.memory_space<vmem>>, %arg4: memref<8x8xf32, #tpu.memory_space<vmem>>, %arg5: memref<8x1xf32, #tpu.memory_space<vmem>>, %arg6: memref<8x8xf32, #tpu.memory_space<vmem>>, %arg7: memref<8x1xf32, #tpu.memory_space<vmem>>, %arg8: memref<8x8xf32, #tpu.memory_space<vmem>>, %arg9: memref<8x1xf32, #tpu.memory_space<vmem>>, %arg10: memref<1x8xf32, #tpu.memory_space<vmem>>, %arg11: memref<1x1xf32, #tpu.memory_space<vmem>>, %arg12: memref<1x128xf32, #tpu.memory_space<vmem>>) attributes {dimension_semantics = [#tpu.dimension_semantics<parallel>], iteration_bounds = array<i64: 1>, scalar_prefetch = 0 : i64, scratch_operands = 0 : i64, tpu.core_type = #tpu.core_type<tc>, window_params = [{transform_indices = @transform_0, window_bounds = array<i64: 12, 128>}, {pipeline_mode = #tpu.pipeline_mode<synchronous>, transform_indices = @transform_1, window_bounds = array<i64: 8, 12>}, {pipeline_mode = #tpu.pipeline_mode<synchronous>, transform_indices = @transform_2, window_bounds = array<i64: 8, 1>}, {pipeline_mode = #tpu.pipeline_mode<synchronous>, transform_indices = @transform_3, window_bounds = array<i64: 8, 8>}, {pipeline_mode = #tpu.pipeline_mode<synchronous>, transform_indices = @transform_4, window_bounds = array<i64: 8, 1>}, {pipeline_mode = #tpu.pipeline_mode<synchronous>, transform_indices = @transform_5, window_bounds = array<i64: 8, 8>}, {pipeline_mode = #tpu.pipeline_mode<synchronous>, transform_indices = @transform_6, window_bounds = array<i64: 8, 1>}, {pipeline_mode = #tpu.pipeline_mode<synchronous>, transform_indices = @transform_7, window_bounds = array<i64: 8, 8>}, {pipeline_mode = #tpu.pipeline_mode<synchronous>, transform_indices = @transform_8, window_bounds = array<i64: 8, 1>}, {pipeline_mode = #tpu.pipeline_mode<synchronous>, transform_indices = @transform_9, window_bounds = array<i64: 1, 8>}, {pipeline_mode = #tpu.pipeline_mode<synchronous>, transform_indices = @transform_10, window_bounds = array<i64: 1, 1>}, {transform_indices = @transform_11, window_bounds = array<i64: 1, 128>}]} {
    %c0 = arith.constant 0 : index
    %c0_0 = arith.constant 0 : index
    %0 = vector.load %arg1[%c0, %c0_0] : memref<12x128xf32, #tpu.memory_space<vmem>>, vector<12x128xf32>
    %c0_1 = arith.constant 0 : index
    %c0_2 = arith.constant 0 : index
    %1 = vector.load %arg2[%c0_1, %c0_2] : memref<8x12xf32, #tpu.memory_space<vmem>>, vector<8x12xf32>
    %cst = arith.constant dense<0.000000e+00> : vector<8x128xf32>
    %2 = tpu.matmul %1, %0, %cst {dimension_numbers = #tpu.dot_dimension_numbers<[1], [0], [0], [1], [0, 0, 1, 1], [], []>} : vector<8x12xf32>, vector<12x128xf32>, vector<8x128xf32> -> vector<8x128xf32>
    %c0_3 = arith.constant 0 : index
    %c0_4 = arith.constant 0 : index
    %3 = vector.load %arg3[%c0_3, %c0_4] : memref<8x1xf32, #tpu.memory_space<vmem>>, vector<8x1xf32>
    %4 = vector.broadcast %3 : vector<8x1xf32> to vector<8x128xf32>
    %5 = arith.addf %2, %4 : vector<8x128xf32>
    %cst_5 = arith.constant 0.000000e+00 : f32
    %6 = vector.broadcast %cst_5 : f32 to vector<8x128xf32>
    %7 = arith.subf %6, %5 : vector<8x128xf32>
    %8 = math.exp %7 : vector<8x128xf32>
    %cst_6 = arith.constant 1.000000e+00 : f32
    %9 = vector.broadcast %cst_6 : f32 to vector<8x128xf32>
    %10 = arith.addf %9, %8 : vector<8x128xf32>
    %11 = tpu.reciprocal %10 {approx = true} : vector<8x128xf32> -> vector<8x128xf32>
    %12 = arith.mulf %5, %11 : vector<8x128xf32>
    %c0_7 = arith.constant 0 : index
    %c0_8 = arith.constant 0 : index
    %13 = vector.load %arg4[%c0_7, %c0_8] : memref<8x8xf32, #tpu.memory_space<vmem>>, vector<8x8xf32>
    %cst_9 = arith.constant dense<0.000000e+00> : vector<8x128xf32>
    %14 = tpu.matmul %13, %12, %cst_9 {dimension_numbers = #tpu.dot_dimension_numbers<[1], [0], [0], [1], [0, 0, 1, 1], [], []>} : vector<8x8xf32>, vector<8x128xf32>, vector<8x128xf32> -> vector<8x128xf32>
    %c0_10 = arith.constant 0 : index
    %c0_11 = arith.constant 0 : index
    %15 = vector.load %arg5[%c0_10, %c0_11] : memref<8x1xf32, #tpu.memory_space<vmem>>, vector<8x1xf32>
    %16 = vector.broadcast %15 : vector<8x1xf32> to vector<8x128xf32>
    %17 = arith.addf %14, %16 : vector<8x128xf32>
    %cst_12 = arith.constant 0.000000e+00 : f32
    %18 = vector.broadcast %cst_12 : f32 to vector<8x128xf32>
    %19 = arith.subf %18, %17 : vector<8x128xf32>
    %20 = math.exp %19 : vector<8x128xf32>
    %cst_13 = arith.constant 1.000000e+00 : f32
    %21 = vector.broadcast %cst_13 : f32 to vector<8x128xf32>
    %22 = arith.addf %21, %20 : vector<8x128xf32>
    %23 = tpu.reciprocal %22 {approx = true} : vector<8x128xf32> -> vector<8x128xf32>
    %24 = arith.mulf %17, %23 : vector<8x128xf32>
    %c0_14 = arith.constant 0 : index
    %c0_15 = arith.constant 0 : index
    %25 = vector.load %arg6[%c0_14, %c0_15] : memref<8x8xf32, #tpu.memory_space<vmem>>, vector<8x8xf32>
    %cst_16 = arith.constant dense<0.000000e+00> : vector<8x128xf32>
    %26 = tpu.matmul %25, %24, %cst_16 {dimension_numbers = #tpu.dot_dimension_numbers<[1], [0], [0], [1], [0, 0, 1, 1], [], []>} : vector<8x8xf32>, vector<8x128xf32>, vector<8x128xf32> -> vector<8x128xf32>
    %c0_17 = arith.constant 0 : index
    %c0_18 = arith.constant 0 : index
    %27 = vector.load %arg7[%c0_17, %c0_18] : memref<8x1xf32, #tpu.memory_space<vmem>>, vector<8x1xf32>
    %28 = vector.broadcast %27 : vector<8x1xf32> to vector<8x128xf32>
    %29 = arith.addf %26, %28 : vector<8x128xf32>
    %cst_19 = arith.constant 0.000000e+00 : f32
    %30 = vector.broadcast %cst_19 : f32 to vector<8x128xf32>
    %31 = arith.subf %30, %29 : vector<8x128xf32>
    %32 = math.exp %31 : vector<8x128xf32>
    %cst_20 = arith.constant 1.000000e+00 : f32
    %33 = vector.broadcast %cst_20 : f32 to vector<8x128xf32>
    %34 = arith.addf %33, %32 : vector<8x128xf32>
    %35 = tpu.reciprocal %34 {approx = true} : vector<8x128xf32> -> vector<8x128xf32>
    %36 = arith.mulf %29, %35 : vector<8x128xf32>
    %c0_21 = arith.constant 0 : index
    %c0_22 = arith.constant 0 : index
    %37 = vector.load %arg8[%c0_21, %c0_22] : memref<8x8xf32, #tpu.memory_space<vmem>>, vector<8x8xf32>
    %cst_23 = arith.constant dense<0.000000e+00> : vector<8x128xf32>
    %38 = tpu.matmul %37, %36, %cst_23 {dimension_numbers = #tpu.dot_dimension_numbers<[1], [0], [0], [1], [0, 0, 1, 1], [], []>} : vector<8x8xf32>, vector<8x128xf32>, vector<8x128xf32> -> vector<8x128xf32>
    %c0_24 = arith.constant 0 : index
    %c0_25 = arith.constant 0 : index
    %39 = vector.load %arg9[%c0_24, %c0_25] : memref<8x1xf32, #tpu.memory_space<vmem>>, vector<8x1xf32>
    %40 = vector.broadcast %39 : vector<8x1xf32> to vector<8x128xf32>
    %41 = arith.addf %38, %40 : vector<8x128xf32>
    %cst_26 = arith.constant 0.000000e+00 : f32
    %42 = vector.broadcast %cst_26 : f32 to vector<8x128xf32>
    %43 = arith.subf %42, %41 : vector<8x128xf32>
    %44 = math.exp %43 : vector<8x128xf32>
    %cst_27 = arith.constant 1.000000e+00 : f32
    %45 = vector.broadcast %cst_27 : f32 to vector<8x128xf32>
    %46 = arith.addf %45, %44 : vector<8x128xf32>
    %47 = tpu.reciprocal %46 {approx = true} : vector<8x128xf32> -> vector<8x128xf32>
    %48 = arith.mulf %41, %47 : vector<8x128xf32>
    %c0_28 = arith.constant 0 : index
    %c0_29 = arith.constant 0 : index
    %49 = vector.load %arg10[%c0_28, %c0_29] : memref<1x8xf32, #tpu.memory_space<vmem>>, vector<1x8xf32>
    %cst_30 = arith.constant dense<0.000000e+00> : vector<1x128xf32>
    %50 = tpu.matmul %49, %48, %cst_30 {dimension_numbers = #tpu.dot_dimension_numbers<[1], [0], [0], [1], [0, 0, 1, 1], [], []>} : vector<1x8xf32>, vector<8x128xf32>, vector<1x128xf32> -> vector<1x128xf32>
    %c0_31 = arith.constant 0 : index
    %c0_32 = arith.constant 0 : index
    %51 = vector.load %arg11[%c0_31, %c0_32] : memref<1x1xf32, #tpu.memory_space<vmem>>, vector<1x1xf32>
    %52 = vector.broadcast %51 : vector<1x1xf32> to vector<1x128xf32>
    %53 = arith.addf %50, %52 : vector<1x128xf32>
    %c0_33 = arith.constant 0 : index
    %c0_34 = arith.constant 0 : index
    %54 = vector.load %arg12[%c0_33, %c0_34] : memref<1x128xf32, #tpu.memory_space<vmem>>, vector<1x128xf32>
    tpu.vector_store %arg12[%c0_33, %c0_34], %53 {strides = array<i32>} : memref<1x128xf32, #tpu.memory_space<vmem>>, vector<1x128xf32>,
    return
  }
  func.func @transform_0(%arg0: i32) -> (i32, i32) {
    %c0_i32 = arith.constant 0 : i32
    %c0_i32_0 = arith.constant 0 : i32
    return %c0_i32, %arg0 : i32, i32
  }
  func.func @transform_1(%arg0: i32) -> (i32, i32) {
    %c0_i32 = arith.constant 0 : i32
    %c0_i32_0 = arith.constant 0 : i32
    %c0_i32_1 = arith.constant 0 : i32
    return %c0_i32, %c0_i32_0 : i32, i32
  }
  func.func @transform_2(%arg0: i32) -> (i32, i32) {
    %c0_i32 = arith.constant 0 : i32
    %c0_i32_0 = arith.constant 0 : i32
    %c0_i32_1 = arith.constant 0 : i32
    return %c0_i32, %c0_i32_0 : i32, i32
  }
  func.func @transform_3(%arg0: i32) -> (i32, i32) {
    %c0_i32 = arith.constant 0 : i32
    %c0_i32_0 = arith.constant 0 : i32
    %c0_i32_1 = arith.constant 0 : i32
    return %c0_i32, %c0_i32_0 : i32, i32
  }
  func.func @transform_4(%arg0: i32) -> (i32, i32) {
    %c0_i32 = arith.constant 0 : i32
    %c0_i32_0 = arith.constant 0 : i32
    %c0_i32_1 = arith.constant 0 : i32
    return %c0_i32, %c0_i32_0 : i32, i32
  }
  func.func @transform_5(%arg0: i32) -> (i32, i32) {
    %c0_i32 = arith.constant 0 : i32
    %c0_i32_0 = arith.constant 0 : i32
    %c0_i32_1 = arith.constant 0 : i32
    return %c0_i32, %c0_i32_0 : i32, i32
  }
  func.func @transform_6(%arg0: i32) -> (i32, i32) {
    %c0_i32 = arith.constant 0 : i32
    %c0_i32_0 = arith.constant 0 : i32
    %c0_i32_1 = arith.constant 0 : i32
    return %c0_i32, %c0_i32_0 : i32, i32
  }
  func.func @transform_7(%arg0: i32) -> (i32, i32) {
    %c0_i32 = arith.constant 0 : i32
    %c0_i32_0 = arith.constant 0 : i32
    %c0_i32_1 = arith.constant 0 : i32
    return %c0_i32, %c0_i32_0 : i32, i32
  }
  func.func @transform_8(%arg0: i32) -> (i32, i32) {
    %c0_i32 = arith.constant 0 : i32
    %c0_i32_0 = arith.constant 0 : i32
    %c0_i32_1 = arith.constant 0 : i32
    return %c0_i32, %c0_i32_0 : i32, i32
  }
  func.func @transform_9(%arg0: i32) -> (i32, i32) {
    %c0_i32 = arith.constant 0 : i32
    %c0_i32_0 = arith.constant 0 : i32
    %c0_i32_1 = arith.constant 0 : i32
    return %c0_i32, %c0_i32_0 : i32, i32
  }
  func.func @transform_10(%arg0: i32) -> (i32, i32) {
    %c0_i32 = arith.constant 0 : i32
    %c0_i32_0 = arith.constant 0 : i32
    %c0_i32_1 = arith.constant 0 : i32
    return %c0_i32, %c0_i32_0 : i32, i32
  }
  func.func @transform_11(%arg0: i32) -> (i32, i32) {
    %c0_i32 = arith.constant 0 : i32
    %c0_i32_0 = arith.constant 0 : i32
    return %c0_i32, %arg0 : i32, i32
  }
}

</mosaic_0001>

<bundles_post_ra>
// kernel: tpu_custom_call.1
= control target key start
LH: loop header
LB: loop body
LE: loop exit
PB: predicated region body
PF: predicated region fallthrough
CT: control target
= control target key end

     0   :  { %s703_s0 = inlined_call_operand.vmem [shape: f32[12,128], index: 0, kind: input, shape index: {}]   ;;  %s704_s1 = inlined_call_operand.vmem [shape: f32[8,12], index: 1, kind: input, shape index: {}]   ;;  %s705_s2 = inlined_call_operand.vmem [shape: f32[8,1], index: 2, kind: input, shape index: {}]   ;;  %s706_s3 = inlined_call_operand.vmem [shape: f32[8,8], index: 3, kind: input, shape index: {}]   ;;  %s707_s4 = inlined_call_operand.vmem [shape: f32[8,1], index: 4, kind: input, shape index: {}]   ;;  %s708_s5 = inlined_call_operand.vmem [shape: f32[8,8], index: 5, kind: input, shape index: {}]   ;;  %s709_s6 = inlined_call_operand.vmem [shape: f32[8,1], index: 6, kind: input, shape index: {}]   ;;  %s710_s7 = inlined_call_operand.vmem [shape: f32[8,8], index: 7, kind: input, shape index: {}]   ;;  %s711_s8 = inlined_call_operand.vmem [shape: f32[8,1], index: 8, kind: input, shape index: {}]   ;;  %s712_s9 = inlined_call_operand.vmem [shape: f32[1,8], index: 9, kind: input, shape index: {}]   ;;  %s713_s10 = inlined_call_operand.<no memory space> [shape: f32[1,1], index: 10, kind: input, shape index: {}]   ;;  %s714_s11 = inlined_call_operand.hbm [shape: f32[1,128], index: 11, kind: output, shape index: {}]  }
   0x1   :  { %v16_v0 = vstv %s713_s10 }
   0x2   :  { %17 = vst [vmem:[#allocation2] sm:$0x1] %v16_v0 }
   0x3   :  { %v42_v1 = vld [vmem:[%s703_s0 + $0x8] sm:$0xf]  ;;  %vm54_vm0 = vcmask 1043456   ;;  %v580_v2 = vmov 0.0   ;;  %v41_v3 = vld [vmem:[%s703_s0] sm:$0xff]  ;;  %vm581_vm1 = vmmov 0  }
   0x4   :  { %509 = vmatprep.subr.mxu0 %v580_v2  ;;  %513 = vmatprep.mubr.msk.f32.mxu0 %vm581_vm1, %v580_v2  ;;  %v44_v4 = vld [vmem:[%s705_s2] sm:$0xff]  ;;  %vm50_vm2 = vcmask 97280   ;;  %v582_v6 = vmov 0  }
   0x5   :  { %510 = vmatpush3.msk.msra.mxu0 %vm54_vm0, %v42_v1  ;;  %v43_v5 = vld [vmem:[%s704_s1] sm:$0xff]  ;;  %540 = vset.pattern.permute.xlu0 %v582_v6 }
   0x6   :  { %18 = vsyncpa [#allocation4], 0  ;;  %511 = vmatprep.subr.mxu0 %v580_v2  ;;  %47 = vperm.xlu0 %540, %v44_v4   ;;  %v135_v7 = vld [vmem:[%s707_s4] sm:$0xff]  ;;  %vm141_vm3 = vcmask 64512   ;;  %v400_v55 = vlaneseq }
   0x7   :  { %512 = vmatpush3.msra.mxu0 %v41_v3  ;;  %516 = vmatprep.subr.mxu1 %v580_v2  ;;  %v134_v19 = vld [vmem:[%s706_s3] sm:$0xff] }
   0x8   :  { %514 = vmatmul.mubr.msk.f32.vlgmr.msra.gmra.mxu0 %vm50_vm2, %v43_v5  ;;  %518 = vmatprep.mubr.msk.f32.mxu1 %vm581_vm1, %v580_v2  ;;  %v222_v20 = vld [vmem:[%s709_s6] sm:$0xff]  ;;  %v401_v56 = vshrl.u32 %v400_v55, 7 }
   0x9   :  { %541 = vset.pattern.permute.xlu1 %v582_v6  ;;  %526 = vmatprep.subr.mxu0 %v580_v2  ;;  %v394_v8 = vld [vmem:[#allocation2] sm:$0x1] }
   0xa   :  { %138 = vperm.xlu0 %540, %v135_v7   ;;  %528 = vmatprep.mubr.msk.f32.mxu0 %vm581_vm1, %v580_v2  ;;  %v308_v21 = vld [vmem:[%s711_s8] sm:$0xff]  ;;  %v402_v57 = vsub.s32 0, %v401_v56 }
   0xb   :  { %225 = vperm.xlu1 %541, %v222_v20   ;;  %v221_v32 = vld [vmem:[%s708_s5] sm:$0xff] }
   0xc   :  { %v307_v43 = vld [vmem:[%s710_s7] sm:$0xff]  ;;  %s583_s7 = smov [#allocation3]  }
   0xd   :  { %v393_v54 = vld [vmem:[%s712_s9] sm:$0x1]  ;;  %s484_s13 = sshll.u32 %s583_s7, 4  ;;  %s485_s13 = int_to_ptr.vmem [resolvable:$true] %s484_s13 }
   0xe   :  { %397 = vperm.xlu0 %540, %v394_v8   ;;  %s558_s14 = scalar_lea.vmem %s485_s13, 16  ;;  %s562_s15 = scalar_lea.vmem %s485_s13, 32 }
   0xf   :  { %311 = vperm.xlu1 %541, %v308_v21   ;;  %p559_p0 = scmp.ne.s32.totalorder %s485_s13, %s558_s14  ;;  %p563_p1 = scmp.lt.s32.totalorder %s485_s13, %s485_s13 }
  0x10   :  { %p564_p2 = scmp.lt.s32.totalorder %s562_s15, %s558_s14 }
  0x12   :  { %p565_p3 = por %p564_p2, %p563_p1 }
  0x14   :  { %p566_p4 = pnand %p565_p3, %p559_p0 }
  0x81   :  { %v48_v9 = vpop.permute.xlu0 %47 }
  0x85   :  { %v139_v22 = vpop.permute.xlu0 %138 }
  0x86   :  { %v226_v33 = vpop.permute.xlu1 %225 }
  0x89   :  { %v398_v58 = vpop.permute.xlu0 %397 }
  0x8a   :  { %v312_v44 = vpop.permute.xlu1 %311  ;;  %v403_v59 = vrot.slane %v398_v58, %v402_v57 }
  0xc8   :  { %v124_v10 = vpop.f32.mrf.mxu0 }
  0xc9   :  { %v125_v11 = vadd.f32 %v124_v10, %v48_v9 }
  0xca   :  { %v515_v12 = vpop.f32.mrf.mxu0 }
  0xcb   :  { %v128_v13 = vsub.f32 0.0, %v125_v11 }
  0xcd   :  { %v129_v14 = vmul.f32 1.442695, %v128_v13 }
  0xcf   :  { %542 = vpow2.f32 %v129_v14 }
  0xdc   :  { %v543_v15 = vpop.eup %542 }
  0xdd   :  { %v131_v16 = vadd.f32 1.0, %v543_v15 }
  0xdf   :  { %544 = vrcp.f32 %v131_v16 }
  0xec   :  { %v545_v17 = vpop.eup %544 }
  0xed   :  { %v133_v18 = vmul.f32 %v545_v17, %v125_v11 }
  0xef   :  { %517 = vmatpush3.msra.mxu1 %v133_v18 }
  0xf0   :  { %519 = vmatmul.mubr.msk.f32.vlgmr.msra.gmra.mxu1 %vm141_vm3, %v134_v19  ;;  %521 = vmatprep.subr.mxu1 %v580_v2 }
  0xf1   :  { %523 = vmatprep.mubr.msk.f32.mxu1 %vm581_vm1, %v580_v2 }
 0x1b0   :  { %v211_v23 = vpop.f32.mrf.mxu1 }
 0x1b1   :  { %v212_v24 = vadd.f32 %v211_v23, %v139_v22 }
 0x1b2   :  { %v520_v25 = vpop.f32.mrf.mxu1 }
 0x1b3   :  { %v215_v26 = vsub.f32 0.0, %v212_v24 }
 0x1b5   :  { %v216_v27 = vmul.f32 1.442695, %v215_v26 }
 0x1b7   :  { %546 = vpow2.f32 %v216_v27 }
 0x1c4   :  { %v547_v28 = vpop.eup %546 }
 0x1c5   :  { %v218_v29 = vadd.f32 1.0, %v547_v28 }
 0x1c7   :  { %548 = vrcp.f32 %v218_v29 }
 0x1d4   :  { %v549_v30 = vpop.eup %548 }
 0x1d5   :  { %v220_v31 = vmul.f32 %v549_v30, %v212_v24 }
 0x1d7   :  { %522 = vmatpush3.msra.mxu1 %v220_v31 }
 0x1d8   :  { %524 = vmatmul.mubr.msk.f32.vlgmr.msra.gmra.mxu1 %vm141_vm3, %v221_v32  ;;  %531 = vmatprep.subr.mxu1 %v580_v2 }
 0x1d9   :  { %533 = vmatprep.mubr.msk.f32.mxu1 %vm581_vm1, %v580_v2 }
 0x298   :  { %v297_v34 = vpop.f32.mrf.mxu1 }
 0x299   :  { %v298_v35 = vadd.f32 %v297_v34, %v226_v33 }
 0x29a   :  { %v525_v36 = vpop.f32.mrf.mxu1 }
 0x29b   :  { %v301_v37 = vsub.f32 0.0, %v298_v35 }
 0x29d   :  { %v302_v38 = vmul.f32 1.442695, %v301_v37 }
 0x29f   :  { %550 = vpow2.f32 %v302_v38 }
 0x2ac   :  { %v551_v39 = vpop.eup %550 }
 0x2ad   :  { %v304_v40 = vadd.f32 1.0, %v551_v39 }
 0x2af   :  { %552 = vrcp.f32 %v304_v40 }
 0x2bc   :  { %v553_v41 = vpop.eup %552 }
 0x2bd   :  { %v306_v42 = vmul.f32 %v553_v41, %v298_v35 }
 0x2bf   :  { %527 = vmatpush3.msra.mxu0 %v306_v42 }
 0x2c0   :  { %529 = vmatmul.mubr.msk.f32.vlgmr.msra.gmra.mxu0 %vm141_vm3, %v307_v43 }
 0x380   :  { %v383_v45 = vpop.f32.mrf.mxu0 }
 0x381   :  { %v384_v46 = vadd.f32 %v383_v45, %v312_v44 }
 0x382   :  { %v530_v47 = vpop.f32.mrf.mxu0 }
 0x383   :  { %v387_v48 = vsub.f32 0.0, %v384_v46 }
 0x385   :  { %v388_v49 = vmul.f32 1.442695, %v387_v48 }
 0x387   :  { %554 = vpow2.f32 %v388_v49 }
 0x394   :  { %v555_v50 = vpop.eup %554 }
 0x395   :  { %v390_v51 = vadd.f32 1.0, %v555_v50 }
 0x397   :  { %556 = vrcp.f32 %v390_v51 }
 0x3a4   :  { %v557_v52 = vpop.eup %556 }
 0x3a5   :  { %v392_v53 = vmul.f32 %v557_v52, %v384_v46 }
 0x3a7   :  { %532 = vmatpush3.msra.mxu1 %v392_v53 }
 0x3a8   :  { %534 = vmatmul.mubr.msk.f32.vlgmr.msra.gmra.mxu1 %vm141_vm3, %v393_v54 }
 0x468   :  { %v473_v60 = vpop.f32.mrf.mxu1 }
 0x469   :  { %v474_v61 = vadd.f32 %v473_v60, %v403_v59 }
 0x46a   :  { %v535_v62 = vpop.f32.mrf.mxu1 }
 0x46b   :  { %477 = vst [vmem:[#allocation3] sm:$0x1] %v474_v61 }
 0x46c   :  { %569 = shalt.err (!%p566_p4)
}
 0x46d   :  { %487 = dma.vmem_to_hbm [thread:$0]  %s485_s13, 16, %s714_s11, [#allocation4]  }
 0x46e   :  { %578 = dma.done.wait [#allocation4], 16  }
 0x46f   :  { %579 = vsyncadd [#allocation4], 4294967280 }
 0x470   :  { %491 = vsyncpa [#allocation4], 1 }

</bundles_post_ra>
